<compile_context>
chip_gen: v7x
topology: tpu7x:2x2x1
jax: 0.10.0
libtpu: 0.0.40
codegen_flags: <defaults>
</compile_context>

<pallas_src>
import math
from functools import partial

import jax
import jax.numpy as jnp
from jax.experimental import pallas as pl
from jax.experimental.pallas import tpu as pltpu

MAX_VAL = 1e9                       # masked_fill(mask == 0, -MAX_VAL) in the reference
GELU_C = math.sqrt(2.0 / math.pi)   # BERT-style tanh GELU constant
LN_EPS = 1e-6                       # BERT4Rec custom LayerNorm eps


# ----------------------------- fused transformer-layer kernel -----------------------------

def _layer_kernel(x_ref, pad_ref,
                  ln1g_ref, ln1b_ref, wqkv_ref, bqkv_ref, wo_ref, bo_ref,
                  ln2g_ref, ln2b_ref, w1_ref, b1_ref, w2_ref, b2_ref,
                  o_ref, *, heads, dk, global_num, window):
    x = x_ref[...]                                     # [L, D] f32
    L, D = x.shape

    def ln(v, g_ref, b_ref):
        mu = jnp.mean(v, axis=-1, keepdims=True)
        var = jnp.mean((v - mu) ** 2, axis=-1, keepdims=True)
        return (v - mu) * jax.lax.rsqrt(var + LN_EPS) * g_ref[...] + b_ref[...]

    def mm(a, w_ref):                                  # bf16 MXU matmul, f32 accumulation
        return jnp.dot(a.astype(jnp.bfloat16), w_ref[...],
                       preferred_element_type=jnp.float32)

    # --- SublayerConnection 1: x + OutProj(Attention(QKV(LayerNorm(x)))) ---
    xn1 = ln(x, ln1g_ref, ln1b_ref)
    qkv = mm(xn1, wqkv_ref) + bqkv_ref[...]            # [L, 3D], fused Q|K|V projection
    scale = 1.0 / math.sqrt(dk)

    # masks generated in-kernel (no [B,H,L,L] HBM tensor)
    pad_ok = jnp.broadcast_to(pad_ref[...] != 0, (L, L))       # key-position padding mask
    rows = jax.lax.broadcasted_iota(jnp.int32, (L, L), 0)
    cols = jax.lax.broadcasted_iota(jnp.int32, (L, L), 1)
    win_ok = jnp.abs(cols - rows) <= window

    head_outs = []
    for h in range(heads):                             # static unroll; heads is small
        q = qkv[:, h * dk:(h + 1) * dk]
        k = qkv[:, D + h * dk:D + (h + 1) * dk]
        v = qkv[:, 2 * D + h * dk:2 * D + (h + 1) * dk]
        s = jax.lax.dot_general(q.astype(jnp.bfloat16), k.astype(jnp.bfloat16),
                                (((1,), (1,)), ((), ())),
                                preferred_element_type=jnp.float32) * scale   # [L, L]
        ok = pad_ok if h < global_num else (pad_ok & win_ok)   # global vs. 'win' local head
        s = jnp.where(ok, s, -MAX_VAL)                          # masked_fill semantics
        m = jnp.max(s, axis=-1, keepdims=True)
        e = jnp.exp(s - m)
        p = e * pl.reciprocal(jnp.sum(e, axis=-1, keepdims=True), approx=True)
        head_outs.append(jnp.dot(p.astype(jnp.bfloat16), v.astype(jnp.bfloat16),
                                 preferred_element_type=jnp.float32))          # [L, dk]
    ao = jnp.concatenate(head_outs, axis=-1)           # [L, D], lane-dense head concat
    x = x + mm(ao, wo_ref) + bo_ref[...]

    # --- SublayerConnection 2: x + W2(GELU(W1(LayerNorm(x)))) ---
    xn2 = ln(x, ln2g_ref, ln2b_ref)
    h1 = mm(xn2, w1_ref) + b1_ref[...]                 # [L, 4D], stays in VMEM
    h1 = 0.5 * h1 * (1.0 + jnp.tanh(GELU_C * (h1 + 0.044715 * h1 ** 3)))
    x = x + mm(h1, w2_ref) + b2_ref[...]

    o_ref[...] = x


def transformer_layer(x, pad_i32, layer, cfg):
    B, L, D = x.shape
    d_ff = layer["W1"].shape[1]
    kern = partial(_layer_kernel, heads=cfg["heads"], dk=D // cfg["heads"],
                   global_num=cfg["global_num"], window=cfg["window"])
    wspec = lambda shp: pl.BlockSpec(shp, lambda b: (0, 0))     # weights: one block, fetched once
    return pl.pallas_call(
        kern,
        out_shape=jax.ShapeDtypeStruct((B, L, D), jnp.float32),
        grid=(B,),
        in_specs=[
            pl.BlockSpec((None, L, D), lambda b: (b, 0, 0)),    # x           (lane-dense [L, D])
            pl.BlockSpec((None, 1, L), lambda b: (b, 0, 0)),    # pad vector
            wspec((1, D)), wspec((1, D)),                       # ln1 gamma/beta
            wspec((D, 3 * D)), wspec((1, 3 * D)),               # fused Wqkv / bqkv
            wspec((D, D)), wspec((1, D)),                       # Wo / bo
            wspec((1, D)), wspec((1, D)),                       # ln2 gamma/beta
            wspec((D, d_ff)), wspec((1, d_ff)),                 # W1 / b1
            wspec((d_ff, D)), wspec((1, D)),                    # W2 / b2
        ],
        out_specs=pl.BlockSpec((None, L, D), lambda b: (b, 0, 0)),
        compiler_params=pltpu.CompilerParams(dimension_semantics=("parallel",)),
    )(x, pad_i32,
      layer["ln1_g"], layer["ln1_b"], layer["Wqkv"], layer["bqkv"],
      layer["Wo"], layer["bo"], layer["ln2_g"], layer["ln2_b"],
      layer["W1"], layer["b1"], layer["W2"], layer["b2"])


# ----------------------------- similarity-score kernel (vocab-tiled) -----------------------------

def _score_kernel(x_ref, emb_ref, bias_ref, o_ref):
    # logits_tile = x @ emb_tile.T + bias_tile  (contraction over D, no transposed copy in HBM)
    s = jax.lax.dot_general(x_ref[...].astype(jnp.bfloat16),
                            emb_ref[...].astype(jnp.bfloat16),
                            (((1,), (1,)), ((), ())),
                            preferred_element_type=jnp.float32)
    o_ref[...] = s + bias_ref[...]


def similarity_score(xm, token_emb, bias_row):
    M, D = xm.shape
    V = token_emb.shape[0]
    # Tile the vocab axis when it is 128-aligned (real LOCKER vocabs); otherwise single full block.
    if V % 128 == 0:
        tv = min(V, 2048)
        while V % tv != 0:
            tv //= 2
    else:
        tv = V
    return pl.pallas_call(
        _score_kernel,
        out_shape=jax.ShapeDtypeStruct((M, V), jnp.float32),
        grid=(V // tv,),
        in_specs=[
            pl.BlockSpec((M, D), lambda j: (0, 0)),
            pl.BlockSpec((tv, D), lambda j: (j, 0)),
            pl.BlockSpec((1, tv), lambda j: (0, j)),
        ],
        out_specs=pl.BlockSpec((M, tv), lambda j: (0, j)),
        compiler_params=pltpu.CompilerParams(dimension_semantics=("parallel",)),
    )(xm, token_emb, bias_row)


# ----------------------------- parameter init -----------------------------

def init_params(key, vocab, max_len, hidden, n_layers):
    def nrm(k, shape, dtype=jnp.float32):
        return (0.02 * jax.random.normal(k, shape)).astype(dtype)

    keys = iter(jax.random.split(key, 2 + n_layers * 6))
    params = {
        "token_emb": nrm(next(keys), (vocab, hidden)),          # f32 (used by gather + score)
        "pos_emb": nrm(next(keys), (max_len, hidden)),
        "bias_emb": jnp.zeros((vocab, 1), jnp.float32),          # self.bias, filled with 0
        "layers": [],
    }
    d_ff = hidden * 4
    for _ in range(n_layers):
        wq, wk, wv = (nrm(next(keys), (hidden, hidden)) for _ in range(3))
        layer = {
            # matmul weights stored bf16 (halves HBM traffic, native MXU dtype); biases / LN f32
            "Wqkv": jnp.concatenate([wq, wk, wv], axis=1).astype(jnp.bfloat16),
            "bqkv": jnp.zeros((1, 3 * hidden), jnp.float32),
            "Wo": nrm(next(keys), (hidden, hidden), jnp.bfloat16),
            "bo": jnp.zeros((1, hidden), jnp.float32),
            "W1": nrm(next(keys), (hidden, d_ff), jnp.bfloat16),
            "b1": jnp.zeros((1, d_ff), jnp.float32),
            "W2": nrm(next(keys), (d_ff, hidden), jnp.bfloat16),
            "b2": jnp.zeros((1, hidden), jnp.float32),
            "ln1_g": jnp.ones((1, hidden), jnp.float32), "ln1_b": jnp.zeros((1, hidden), jnp.float32),
            "ln2_g": jnp.ones((1, hidden), jnp.float32), "ln2_b": jnp.zeros((1, hidden), jnp.float32),
        }
        params["layers"].append(layer)
    return params


# ----------------------------- forward pass -----------------------------

def locker_forward(params, x_tokens, idx1, idx2, cfg):
    B, L = x_tokens.shape

    # key-padding vector [B, 1, L]; full attention mask is generated inside the layer kernel
    pad_i32 = (x_tokens != cfg["pad_token"]).astype(jnp.int32)[:, None, :]

    # BERTEmbedding: token + positional (is_pos=True for local_type='win'); dropout = identity
    x = params["token_emb"][x_tokens] + params["pos_emb"][None, :L, :]      # [B, L, D]

    # NOTE: the reference also computes a FISM 'users'/'u' tensor, but it is only consumed by
    # the local_type='adapt' branch and is dead for 'win', so it is omitted here.
    # TODO(synk): 'conv'/'rnn'/'initial'/'adapt' local-attention branches and the CrossEntropy
    #             loss path (labels=None) are not implemented; dropout treated as eval-mode identity.

    for layer in params["layers"]:
        x = transformer_layer(x, pad_i32, layer, cfg)

    xm = x[idx1, idx2]                                                       # [Nmask, D]
    bias_row = params["bias_emb"].reshape(1, -1)
    return similarity_score(xm, params["token_emb"], bias_row)               # [Nmask, vocab]


# ----------------------------- main -----------------------------

if __name__ == "__main__":
    # synthetic args (mirrors LOCKERModel.__init__): local_type='win', global + local heads
    cfg = dict(
        num_items=10,
        hidden=32,
        heads=4,
        n_layers=2,
        max_len=16,
        global_num=2,      # bert_num_heads - local_num_heads
        window=2,          # args.init_val for local_type='win'
    )
    cfg["mask_token"] = cfg["num_items"]        # 10
    cfg["pad_token"] = cfg["num_items"] + 1     # 11
    vocab = cfg["num_items"] + 2                # 12

    B, L = 2, cfg["max_len"]

    key = jax.random.PRNGKey(0)
    k_tok, k_par = jax.random.split(key)

    # deterministic token sequences: items in [0, num_items), some left padding, mask at last position
    items = jax.random.randint(k_tok, (B, L), 0, cfg["num_items"])
    x_tokens = items
    x_tokens = x_tokens.at[0, :3].set(cfg["pad_token"])    # pad a few positions in sample 0
    x_tokens = x_tokens.at[0, -1].set(cfg["mask_token"])   # one masked position per sample
    x_tokens = x_tokens.at[1, -1].set(cfg["mask_token"])
    x_tokens = x_tokens.astype(jnp.int32)

    params = init_params(k_par, vocab, cfg["max_len"], cfg["hidden"], cfg["n_layers"])

    # select_predict_index: eager host-side nonzero (kept outside jit), as in the reference
    idx1, idx2 = jnp.nonzero(x_tokens == cfg["mask_token"])

    fwd = jax.jit(partial(locker_forward, cfg=cfg))
    logits = fwd(params, x_tokens, idx1, idx2)
    jax.block_until_ready(logits)

    assert logits.shape == (2, vocab), logits.shape
    assert bool(jnp.all(jnp.isfinite(logits)))
    print("KERNEL_OK")
</pallas_src>

<mosaic_0001>
module attributes {stable_mosaic.version = 11 : i64} {
  func.func @_score_kernel(%arg0: i32, %arg1: memref<2x32xf32, #tpu.memory_space<vmem>>, %arg2: memref<12x32xf32, #tpu.memory_space<vmem>>, %arg3: memref<1x12xf32, #tpu.memory_space<vmem>>, %arg4: memref<2x12xf32, #tpu.memory_space<vmem>>) attributes {dimension_semantics = [#tpu.dimension_semantics<parallel>], iteration_bounds = array<i64: 1>, scalar_prefetch = 0 : i64, scratch_operands = 0 : i64, tpu.core_type = #tpu.core_type<tc>, window_params = [{pipeline_mode = #tpu.pipeline_mode<synchronous>, transform_indices = @transform_0, window_bounds = array<i64: 2, 32>}, {transform_indices = @transform_1, window_bounds = array<i64: 12, 32>}, {transform_indices = @transform_2, window_bounds = array<i64: 1, 12>}, {transform_indices = @transform_3, window_bounds = array<i64: 2, 12>}]} {
    %c0 = arith.constant 0 : index
    %c0_0 = arith.constant 0 : index
    %0 = vector.load %arg1[%c0, %c0_0] : memref<2x32xf32, #tpu.memory_space<vmem>>, vector<2x32xf32>
    %1 = arith.truncf %0 : vector<2x32xf32> to vector<2x32xbf16>
    %c0_1 = arith.constant 0 : index
    %c0_2 = arith.constant 0 : index
    %2 = vector.load %arg2[%c0_1, %c0_2] : memref<12x32xf32, #tpu.memory_space<vmem>>, vector<12x32xf32>
    %3 = arith.truncf %2 : vector<12x32xf32> to vector<12x32xbf16>
    %cst = arith.constant dense<0.000000e+00> : vector<2x12xf32>
    %4 = tpu.matmul %1, %3, %cst {dimension_numbers = #tpu.dot_dimension_numbers<[1], [1], [0], [0], [0, 0, 1, 0], [], []>} : vector<2x32xbf16>, vector<12x32xbf16>, vector<2x12xf32> -> vector<2x12xf32>
    %c0_3 = arith.constant 0 : index
    %c0_4 = arith.constant 0 : index
    %5 = vector.load %arg3[%c0_3, %c0_4] : memref<1x12xf32, #tpu.memory_space<vmem>>, vector<1x12xf32>
    %6 = vector.broadcast %5 : vector<1x12xf32> to vector<2x12xf32>
    %7 = arith.addf %4, %6 : vector<2x12xf32>
    %c0_5 = arith.constant 0 : index
    %c0_6 = arith.constant 0 : index
    %8 = vector.load %arg4[%c0_5, %c0_6] : memref<2x12xf32, #tpu.memory_space<vmem>>, vector<2x12xf32>
    tpu.vector_store %arg4[%c0_5, %c0_6], %7 {strides = array<i32>} : memref<2x12xf32, #tpu.memory_space<vmem>>, vector<2x12xf32>,
    return
  }
  func.func @transform_0(%arg0: i32) -> (i32, i32) {
    %c0_i32 = arith.constant 0 : i32
    %c0_i32_0 = arith.constant 0 : i32
    %c0_i32_1 = arith.constant 0 : i32
    return %c0_i32, %c0_i32_0 : i32, i32
  }
  func.func @transform_1(%arg0: i32) -> (i32, i32) {
    %c0_i32 = arith.constant 0 : i32
    %c0_i32_0 = arith.constant 0 : i32
    return %arg0, %c0_i32 : i32, i32
  }
  func.func @transform_2(%arg0: i32) -> (i32, i32) {
    %c0_i32 = arith.constant 0 : i32
    %c0_i32_0 = arith.constant 0 : i32
    return %c0_i32, %arg0 : i32, i32
  }
  func.func @transform_3(%arg0: i32) -> (i32, i32) {
    %c0_i32 = arith.constant 0 : i32
    %c0_i32_0 = arith.constant 0 : i32
    return %c0_i32, %arg0 : i32, i32
  }
}

module attributes {stable_mosaic.version = 11 : i64} {
  func.func @_layer_kernel(%arg0: i32, %arg1: memref<1x16x32xf32, #tpu.memory_space<vmem>>, %arg2: memref<1x1x16xi32, #tpu.memory_space<vmem>>, %arg3: memref<1x32xf32, #tpu.memory_space<vmem>>, %arg4: memref<1x32xf32, #tpu.memory_space<vmem>>, %arg5: memref<32x96xbf16, #tpu.memory_space<vmem>>, %arg6: memref<1x96xf32, #tpu.memory_space<vmem>>, %arg7: memref<32x32xbf16, #tpu.memory_space<vmem>>, %arg8: memref<1x32xf32, #tpu.memory_space<vmem>>, %arg9: memref<1x32xf32, #tpu.memory_space<vmem>>, %arg10: memref<1x32xf32, #tpu.memory_space<vmem>>, %arg11: memref<32x128xbf16, #tpu.memory_space<vmem>>, %arg12: memref<1x128xf32, #tpu.memory_space<vmem>>, %arg13: memref<128x32xbf16, #tpu.memory_space<vmem>>, %arg14: memref<1x32xf32, #tpu.memory_space<vmem>>, %arg15: memref<1x16x32xf32, #tpu.memory_space<vmem>>) attributes {dimension_semantics = [#tpu.dimension_semantics<parallel>], iteration_bounds = array<i64: 2>, scalar_prefetch = 0 : i64, scratch_operands = 0 : i64, tpu.core_type = #tpu.core_type<tc>, window_params = [{transform_indices = @transform_0, window_bounds = array<i64: 1, 16, 32>}, {transform_indices = @transform_1, window_bounds = array<i64: 1, 1, 16>}, {pipeline_mode = #tpu.pipeline_mode<synchronous>, transform_indices = @transform_2, window_bounds = array<i64: 1, 32>}, {pipeline_mode = #tpu.pipeline_mode<synchronous>, transform_indices = @transform_3, window_bounds = array<i64: 1, 32>}, {pipeline_mode = #tpu.pipeline_mode<synchronous>, transform_indices = @transform_4, window_bounds = array<i64: 32, 96>}, {pipeline_mode = #tpu.pipeline_mode<synchronous>, transform_indices = @transform_5, window_bounds = array<i64: 1, 96>}, {pipeline_mode = #tpu.pipeline_mode<synchronous>, transform_indices = @transform_6, window_bounds = array<i64: 32, 32>}, {pipeline_mode = #tpu.pipeline_mode<synchronous>, transform_indices = @transform_7, window_bounds = array<i64: 1, 32>}, {pipeline_mode = #tpu.pipeline_mode<synchronous>, transform_indices = @transform_8, window_bounds = array<i64: 1, 32>}, {pipeline_mode = #tpu.pipeline_mode<synchronous>, transform_indices = @transform_9, window_bounds = array<i64: 1, 32>}, {pipeline_mode = #tpu.pipeline_mode<synchronous>, transform_indices = @transform_10, window_bounds = array<i64: 32, 128>}, {pipeline_mode = #tpu.pipeline_mode<synchronous>, transform_indices = @transform_11, window_bounds = array<i64: 1, 128>}, {pipeline_mode = #tpu.pipeline_mode<synchronous>, transform_indices = @transform_12, window_bounds = array<i64: 128, 32>}, {pipeline_mode = #tpu.pipeline_mode<synchronous>, transform_indices = @transform_13, window_bounds = array<i64: 1, 32>}, {transform_indices = @transform_14, window_bounds = array<i64: 1, 16, 32>}]} {
    %c0 = arith.constant 0 : index
    %c0_0 = arith.constant 0 : index
    %c0_1 = arith.constant 0 : index
    %0 = vector.load %arg1[%c0, %c0_0, %c0_1] : memref<1x16x32xf32, #tpu.memory_space<vmem>>, vector<1x16x32xf32>
    %1 = vector.shape_cast %0 : vector<1x16x32xf32> to vector<16x32xf32>
    %cst = arith.constant dense<0.000000e+00> : vector<16xf32>
    %2 = vector.multi_reduction <add>, %1, %cst [1] : vector<16x32xf32> to vector<16xf32>
    %3 = vector.shape_cast %2 : vector<16xf32> to vector<16x1xf32>
    %cst_2 = arith.constant 3.200000e+01 : f32
    %4 = vector.broadcast %cst_2 : f32 to vector<16x1xf32>
    %5 = arith.divf %3, %4 : vector<16x1xf32>
    %6 = vector.broadcast %5 : vector<16x1xf32> to vector<16x32xf32>
    %7 = arith.subf %1, %6 : vector<16x32xf32>
    %8 = arith.mulf %7, %7 : vector<16x32xf32>
    %cst_3 = arith.constant dense<0.000000e+00> : vector<16xf32>
    %9 = vector.multi_reduction <add>, %8, %cst_3 [1] : vector<16x32xf32> to vector<16xf32>
    %10 = vector.shape_cast %9 : vector<16xf32> to vector<16x1xf32>
    %cst_4 = arith.constant 3.200000e+01 : f32
    %11 = vector.broadcast %cst_4 : f32 to vector<16x1xf32>
    %12 = arith.divf %10, %11 : vector<16x1xf32>
    %13 = vector.broadcast %5 : vector<16x1xf32> to vector<16x32xf32>
    %14 = arith.subf %1, %13 : vector<16x32xf32>
    %cst_5 = arith.constant 9.99999997E-7 : f32
    %15 = vector.broadcast %cst_5 : f32 to vector<16x1xf32>
    %16 = arith.addf %12, %15 : vector<16x1xf32>
    %17 = math.rsqrt %16 : vector<16x1xf32>
    %18 = vector.broadcast %17 : vector<16x1xf32> to vector<16x32xf32>
    %19 = arith.mulf %14, %18 : vector<16x32xf32>
    %c0_6 = arith.constant 0 : index
    %c0_7 = arith.constant 0 : index
    %20 = vector.load %arg3[%c0_6, %c0_7] : memref<1x32xf32, #tpu.memory_space<vmem>>, vector<1x32xf32>
    %21 = vector.broadcast %20 : vector<1x32xf32> to vector<16x32xf32>
    %22 = arith.mulf %19, %21 : vector<16x32xf32>
    %c0_8 = arith.constant 0 : index
    %c0_9 = arith.constant 0 : index
    %23 = vector.load %arg4[%c0_8, %c0_9] : memref<1x32xf32, #tpu.memory_space<vmem>>, vector<1x32xf32>
    %24 = vector.broadcast %23 : vector<1x32xf32> to vector<16x32xf32>
    %25 = arith.addf %22, %24 : vector<16x32xf32>
    %26 = arith.truncf %25 : vector<16x32xf32> to vector<16x32xbf16>
    %c0_10 = arith.constant 0 : index
    %c0_11 = arith.constant 0 : index
    %27 = vector.load %arg5[%c0_10, %c0_11] : memref<32x96xbf16, #tpu.memory_space<vmem>>, vector<32x96xbf16>
    %cst_12 = arith.constant dense<0.000000e+00> : vector<16x96xf32>
    %28 = tpu.matmul %26, %27, %cst_12 {dimension_numbers = #tpu.dot_dimension_numbers<[1], [0], [0], [1], [0, 0, 1, 1], [], []>} : vector<16x32xbf16>, vector<32x96xbf16>, vector<16x96xf32> -> vector<16x96xf32>
    %c0_13 = arith.constant 0 : index
    %c0_14 = arith.constant 0 : index
    %29 = vector.load %arg6[%c0_13, %c0_14] : memref<1x96xf32, #tpu.memory_space<vmem>>, vector<1x96xf32>
    %30 = vector.broadcast %29 : vector<1x96xf32> to vector<16x96xf32>
    %31 = arith.addf %28, %30 : vector<16x96xf32>
    %c0_15 = arith.constant 0 : index
    %c0_16 = arith.constant 0 : index
    %c0_17 = arith.constant 0 : index
    %32 = vector.load %arg2[%c0_15, %c0_16, %c0_17] : memref<1x1x16xi32, #tpu.memory_space<vmem>>, vector<1x1x16xi32>
    %33 = vector.shape_cast %32 : vector<1x1x16xi32> to vector<1x16xi32>
    %c0_i32 = arith.constant 0 : i32
    %34 = vector.broadcast %c0_i32 : i32 to vector<1x16xi32>
    %35 = arith.cmpi ne, %33, %34 : vector<1x16xi32>
    %36 = vector.shape_cast %35 : vector<1x16xi1> to vector<1x16xi1>
    %37 = vector.broadcast %36 : vector<1x16xi1> to vector<16x16xi1>
    %38 = tpu.iota {dimensions = array<i32: 0>} : vector<16x16xi32>
    %39 = tpu.iota {dimensions = array<i32: 1>} : vector<16x16xi32>
    %40 = arith.subi %39, %38 : vector<16x16xi32>
    %41 = math.absi %40 : vector<16x16xi32>
    %c2_i32 = arith.constant 2 : i32
    %42 = vector.broadcast %c2_i32 : i32 to vector<16x16xi32>
    %43 = arith.cmpi sle, %41, %42 : vector<16x16xi32>
    %44 = vector.extract_strided_slice %31 {offsets = [0, 0], sizes = [16, 8], strides = [1, 1]} : vector<16x96xf32> to vector<16x8xf32>
    %45 = vector.extract_strided_slice %31 {offsets = [0, 32], sizes = [16, 8], strides = [1, 1]} : vector<16x96xf32> to vector<16x8xf32>
    %46 = vector.extract_strided_slice %31 {offsets = [0, 64], sizes = [16, 8], strides = [1, 1]} : vector<16x96xf32> to vector<16x8xf32>
    %47 = arith.truncf %44 : vector<16x8xf32> to vector<16x8xbf16>
    %48 = arith.truncf %45 : vector<16x8xf32> to vector<16x8xbf16>
    %cst_18 = arith.constant dense<0.000000e+00> : vector<16x16xf32>
    %49 = tpu.matmul %47, %48, %cst_18 {dimension_numbers = #tpu.dot_dimension_numbers<[1], [1], [0], [0], [0, 0, 1, 0], [], []>} : vector<16x8xbf16>, vector<16x8xbf16>, vector<16x16xf32> -> vector<16x16xf32>
    %cst_19 = arith.constant 0.353553385 : f32
    %50 = vector.broadcast %cst_19 : f32 to vector<16x16xf32>
    %51 = arith.mulf %49, %50 : vector<16x16xf32>
    %cst_20 = arith.constant -1.000000e+09 : f32
    %52 = vector.broadcast %cst_20 : f32 to vector<16x16xf32>
    %53 = arith.select %37, %51, %52 : vector<16x16xi1>, vector<16x16xf32>
    %cst_21 = arith.constant dense<0xFF800000> : vector<16xf32>
    %54 = vector.multi_reduction <maximumf>, %53, %cst_21 [1] : vector<16x16xf32> to vector<16xf32>
    %55 = vector.shape_cast %54 : vector<16xf32> to vector<16x1xf32>
    %56 = vector.broadcast %55 : vector<16x1xf32> to vector<16x16xf32>
    %57 = arith.subf %53, %56 : vector<16x16xf32>
    %58 = math.exp %57 : vector<16x16xf32>
    %cst_22 = arith.constant dense<0.000000e+00> : vector<16xf32>
    %59 = vector.multi_reduction <add>, %58, %cst_22 [1] : vector<16x16xf32> to vector<16xf32>
    %60 = vector.shape_cast %59 : vector<16xf32> to vector<16x1xf32>
    %61 = tpu.reciprocal %60 {approx = true} : vector<16x1xf32> -> vector<16x1xf32>
    %62 = vector.broadcast %61 : vector<16x1xf32> to vector<16x16xf32>
    %63 = arith.mulf %58, %62 : vector<16x16xf32>
    %64 = arith.truncf %63 : vector<16x16xf32> to vector<16x16xbf16>
    %65 = arith.truncf %46 : vector<16x8xf32> to vector<16x8xbf16>
    %cst_23 = arith.constant dense<0.000000e+00> : vector<16x8xf32>
    %66 = tpu.matmul %64, %65, %cst_23 {dimension_numbers = #tpu.dot_dimension_numbers<[1], [0], [0], [1], [0, 0, 1, 1], [], []>} : vector<16x16xbf16>, vector<16x8xbf16>, vector<16x8xf32> -> vector<16x8xf32>
    %67 = vector.extract_strided_slice %31 {offsets = [0, 8], sizes = [16, 8], strides = [1, 1]} : vector<16x96xf32> to vector<16x8xf32>
    %68 = vector.extract_strided_slice %31 {offsets = [0, 40], sizes = [16, 8], strides = [1, 1]} : vector<16x96xf32> to vector<16x8xf32>
    %69 = vector.extract_strided_slice %31 {offsets = [0, 72], sizes = [16, 8], strides = [1, 1]} : vector<16x96xf32> to vector<16x8xf32>
    %70 = arith.truncf %67 : vector<16x8xf32> to vector<16x8xbf16>
    %71 = arith.truncf %68 : vector<16x8xf32> to vector<16x8xbf16>
    %cst_24 = arith.constant dense<0.000000e+00> : vector<16x16xf32>
    %72 = tpu.matmul %70, %71, %cst_24 {dimension_numbers = #tpu.dot_dimension_numbers<[1], [1], [0], [0], [0, 0, 1, 0], [], []>} : vector<16x8xbf16>, vector<16x8xbf16>, vector<16x16xf32> -> vector<16x16xf32>
    %cst_25 = arith.constant 0.353553385 : f32
    %73 = vector.broadcast %cst_25 : f32 to vector<16x16xf32>
    %74 = arith.mulf %72, %73 : vector<16x16xf32>
    %cst_26 = arith.constant -1.000000e+09 : f32
    %75 = vector.broadcast %cst_26 : f32 to vector<16x16xf32>
    %76 = arith.select %37, %74, %75 : vector<16x16xi1>, vector<16x16xf32>
    %cst_27 = arith.constant dense<0xFF800000> : vector<16xf32>
    %77 = vector.multi_reduction <maximumf>, %76, %cst_27 [1] : vector<16x16xf32> to vector<16xf32>
    %78 = vector.shape_cast %77 : vector<16xf32> to vector<16x1xf32>
    %79 = vector.broadcast %78 : vector<16x1xf32> to vector<16x16xf32>
    %80 = arith.subf %76, %79 : vector<16x16xf32>
    %81 = math.exp %80 : vector<16x16xf32>
    %cst_28 = arith.constant dense<0.000000e+00> : vector<16xf32>
    %82 = vector.multi_reduction <add>, %81, %cst_28 [1] : vector<16x16xf32> to vector<16xf32>
    %83 = vector.shape_cast %82 : vector<16xf32> to vector<16x1xf32>
    %84 = tpu.reciprocal %83 {approx = true} : vector<16x1xf32> -> vector<16x1xf32>
    %85 = vector.broadcast %84 : vector<16x1xf32> to vector<16x16xf32>
    %86 = arith.mulf %81, %85 : vector<16x16xf32>
    %87 = arith.truncf %86 : vector<16x16xf32> to vector<16x16xbf16>
    %88 = arith.truncf %69 : vector<16x8xf32> to vector<16x8xbf16>
    %cst_29 = arith.constant dense<0.000000e+00> : vector<16x8xf32>
    %89 = tpu.matmul %87, %88, %cst_29 {dimension_numbers = #tpu.dot_dimension_numbers<[1], [0], [0], [1], [0, 0, 1, 1], [], []>} : vector<16x16xbf16>, vector<16x8xbf16>, vector<16x8xf32> -> vector<16x8xf32>
    %90 = vector.extract_strided_slice %31 {offsets = [0, 16], sizes = [16, 8], strides = [1, 1]} : vector<16x96xf32> to vector<16x8xf32>
    %91 = vector.extract_strided_slice %31 {offsets = [0, 48], sizes = [16, 8], strides = [1, 1]} : vector<16x96xf32> to vector<16x8xf32>
    %92 = vector.extract_strided_slice %31 {offsets = [0, 80], sizes = [16, 8], strides = [1, 1]} : vector<16x96xf32> to vector<16x8xf32>
    %93 = arith.truncf %90 : vector<16x8xf32> to vector<16x8xbf16>
    %94 = arith.truncf %91 : vector<16x8xf32> to vector<16x8xbf16>
    %cst_30 = arith.constant dense<0.000000e+00> : vector<16x16xf32>
    %95 = tpu.matmul %93, %94, %cst_30 {dimension_numbers = #tpu.dot_dimension_numbers<[1], [1], [0], [0], [0, 0, 1, 0], [], []>} : vector<16x8xbf16>, vector<16x8xbf16>, vector<16x16xf32> -> vector<16x16xf32>
    %cst_31 = arith.constant 0.353553385 : f32
    %96 = vector.broadcast %cst_31 : f32 to vector<16x16xf32>
    %97 = arith.mulf %95, %96 : vector<16x16xf32>
    %98 = arith.andi %37, %43 : vector<16x16xi1>
    %cst_32 = arith.constant -1.000000e+09 : f32
    %99 = vector.broadcast %cst_32 : f32 to vector<16x16xf32>
    %100 = arith.select %98, %97, %99 : vector<16x16xi1>, vector<16x16xf32>
    %cst_33 = arith.constant dense<0xFF800000> : vector<16xf32>
    %101 = vector.multi_reduction <maximumf>, %100, %cst_33 [1] : vector<16x16xf32> to vector<16xf32>
    %102 = vector.shape_cast %101 : vector<16xf32> to vector<16x1xf32>
    %103 = vector.broadcast %102 : vector<16x1xf32> to vector<16x16xf32>
    %104 = arith.subf %100, %103 : vector<16x16xf32>
    %105 = math.exp %104 : vector<16x16xf32>
    %cst_34 = arith.constant dense<0.000000e+00> : vector<16xf32>
    %106 = vector.multi_reduction <add>, %105, %cst_34 [1] : vector<16x16xf32> to vector<16xf32>
    %107 = vector.shape_cast %106 : vector<16xf32> to vector<16x1xf32>
    %108 = tpu.reciprocal %107 {approx = true} : vector<16x1xf32> -> vector<16x1xf32>
    %109 = vector.broadcast %108 : vector<16x1xf32> to vector<16x16xf32>
    %110 = arith.mulf %105, %109 : vector<16x16xf32>
    %111 = arith.truncf %110 : vector<16x16xf32> to vector<16x16xbf16>
    %112 = arith.truncf %92 : vector<16x8xf32> to vector<16x8xbf16>
    %cst_35 = arith.constant dense<0.000000e+00> : vector<16x8xf32>
    %113 = tpu.matmul %111, %112, %cst_35 {dimension_numbers = #tpu.dot_dimension_numbers<[1], [0], [0], [1], [0, 0, 1, 1], [], []>} : vector<16x16xbf16>, vector<16x8xbf16>, vector<16x8xf32> -> vector<16x8xf32>
    %114 = vector.extract_strided_slice %31 {offsets = [0, 24], sizes = [16, 8], strides = [1, 1]} : vector<16x96xf32> to vector<16x8xf32>
    %115 = vector.extract_strided_slice %31 {offsets = [0, 56], sizes = [16, 8], strides = [1, 1]} : vector<16x96xf32> to vector<16x8xf32>
    %116 = vector.extract_strided_slice %31 {offsets = [0, 88], sizes = [16, 8], strides = [1, 1]} : vector<16x96xf32> to vector<16x8xf32>
    %117 = arith.truncf %114 : vector<16x8xf32> to vector<16x8xbf16>
    %118 = arith.truncf %115 : vector<16x8xf32> to vector<16x8xbf16>
    %cst_36 = arith.constant dense<0.000000e+00> : vector<16x16xf32>
    %119 = tpu.matmul %117, %118, %cst_36 {dimension_numbers = #tpu.dot_dimension_numbers<[1], [1], [0], [0], [0, 0, 1, 0], [], []>} : vector<16x8xbf16>, vector<16x8xbf16>, vector<16x16xf32> -> vector<16x16xf32>
    %cst_37 = arith.constant 0.353553385 : f32
    %120 = vector.broadcast %cst_37 : f32 to vector<16x16xf32>
    %121 = arith.mulf %119, %120 : vector<16x16xf32>
    %122 = arith.andi %37, %43 : vector<16x16xi1>
    %cst_38 = arith.constant -1.000000e+09 : f32
    %123 = vector.broadcast %cst_38 : f32 to vector<16x16xf32>
    %124 = arith.select %122, %121, %123 : vector<16x16xi1>, vector<16x16xf32>
    %cst_39 = arith.constant dense<0xFF800000> : vector<16xf32>
    %125 = vector.multi_reduction <maximumf>, %124, %cst_39 [1] : vector<16x16xf32> to vector<16xf32>
    %126 = vector.shape_cast %125 : vector<16xf32> to vector<16x1xf32>
    %127 = vector.broadcast %126 : vector<16x1xf32> to vector<16x16xf32>
    %128 = arith.subf %124, %127 : vector<16x16xf32>
    %129 = math.exp %128 : vector<16x16xf32>
    %cst_40 = arith.constant dense<0.000000e+00> : vector<16xf32>
    %130 = vector.multi_reduction <add>, %129, %cst_40 [1] : vector<16x16xf32> to vector<16xf32>
    %131 = vector.shape_cast %130 : vector<16xf32> to vector<16x1xf32>
    %132 = tpu.reciprocal %131 {approx = true} : vector<16x1xf32> -> vector<16x1xf32>
    %133 = vector.broadcast %132 : vector<16x1xf32> to vector<16x16xf32>
    %134 = arith.mulf %129, %133 : vector<16x16xf32>
    %135 = arith.truncf %134 : vector<16x16xf32> to vector<16x16xbf16>
    %136 = arith.truncf %116 : vector<16x8xf32> to vector<16x8xbf16>
    %cst_41 = arith.constant dense<0.000000e+00> : vector<16x8xf32>
    %137 = tpu.matmul %135, %136, %cst_41 {dimension_numbers = #tpu.dot_dimension_numbers<[1], [0], [0], [1], [0, 0, 1, 1], [], []>} : vector<16x16xbf16>, vector<16x8xbf16>, vector<16x8xf32> -> vector<16x8xf32>
    %138 = tpu.concatenate %66, %89, %113, %137 in 1 : vector<16x8xf32>, vector<16x8xf32>, vector<16x8xf32>, vector<16x8xf32> -> vector<16x32xf32>
    %139 = arith.truncf %138 : vector<16x32xf32> to vector<16x32xbf16>
    %c0_42 = arith.constant 0 : index
    %c0_43 = arith.constant 0 : index
    %140 = vector.load %arg7[%c0_42, %c0_43] : memref<32x32xbf16, #tpu.memory_space<vmem>>, vector<32x32xbf16>
    %cst_44 = arith.constant dense<0.000000e+00> : vector<16x32xf32>
    %141 = tpu.matmul %139, %140, %cst_44 {dimension_numbers = #tpu.dot_dimension_numbers<[1], [0], [0], [1], [0, 0, 1, 1], [], []>} : vector<16x32xbf16>, vector<32x32xbf16>, vector<16x32xf32> -> vector<16x32xf32>
    %142 = arith.addf %1, %141 : vector<16x32xf32>
    %c0_45 = arith.constant 0 : index
    %c0_46 = arith.constant 0 : index
    %143 = vector.load %arg8[%c0_45, %c0_46] : memref<1x32xf32, #tpu.memory_space<vmem>>, vector<1x32xf32>
    %144 = vector.broadcast %143 : vector<1x32xf32> to vector<16x32xf32>
    %145 = arith.addf %142, %144 : vector<16x32xf32>
    %cst_47 = arith.constant dense<0.000000e+00> : vector<16xf32>
    %146 = vector.multi_reduction <add>, %145, %cst_47 [1] : vector<16x32xf32> to vector<16xf32>
    %147 = vector.shape_cast %146 : vector<16xf32> to vector<16x1xf32>
    %cst_48 = arith.constant 3.200000e+01 : f32
    %148 = vector.broadcast %cst_48 : f32 to vector<16x1xf32>
    %149 = arith.divf %147, %148 : vector<16x1xf32>
    %150 = vector.broadcast %149 : vector<16x1xf32> to vector<16x32xf32>
    %151 = arith.subf %145, %150 : vector<16x32xf32>
    %152 = arith.mulf %151, %151 : vector<16x32xf32>
    %cst_49 = arith.constant dense<0.000000e+00> : vector<16xf32>
    %153 = vector.multi_reduction <add>, %152, %cst_49 [1] : vector<16x32xf32> to vector<16xf32>
    %154 = vector.shape_cast %153 : vector<16xf32> to vector<16x1xf32>
    %cst_50 = arith.constant 3.200000e+01 : f32
    %155 = vector.broadcast %cst_50 : f32 to vector<16x1xf32>
    %156 = arith.divf %154, %155 : vector<16x1xf32>
    %157 = vector.broadcast %149 : vector<16x1xf32> to vector<16x32xf32>
    %158 = arith.subf %145, %157 : vector<16x32xf32>
    %cst_51 = arith.constant 9.99999997E-7 : f32
    %159 = vector.broadcast %cst_51 : f32 to vector<16x1xf32>
    %160 = arith.addf %156, %159 : vector<16x1xf32>
    %161 = math.rsqrt %160 : vector<16x1xf32>
    %162 = vector.broadcast %161 : vector<16x1xf32> to vector<16x32xf32>
    %163 = arith.mulf %158, %162 : vector<16x32xf32>
    %c0_52 = arith.constant 0 : index
    %c0_53 = arith.constant 0 : index
    %164 = vector.load %arg9[%c0_52, %c0_53] : memref<1x32xf32, #tpu.memory_space<vmem>>, vector<1x32xf32>
    %165 = vector.broadcast %164 : vector<1x32xf32> to vector<16x32xf32>
    %166 = arith.mulf %163, %165 : vector<16x32xf32>
    %c0_54 = arith.constant 0 : index
    %c0_55 = arith.constant 0 : index
    %167 = vector.load %arg10[%c0_54, %c0_55] : memref<1x32xf32, #tpu.memory_space<vmem>>, vector<1x32xf32>
    %168 = vector.broadcast %167 : vector<1x32xf32> to vector<16x32xf32>
    %169 = arith.addf %166, %168 : vector<16x32xf32>
    %170 = arith.truncf %169 : vector<16x32xf32> to vector<16x32xbf16>
    %c0_56 = arith.constant 0 : index
    %c0_57 = arith.constant 0 : index
    %171 = vector.load %arg11[%c0_56, %c0_57] : memref<32x128xbf16, #tpu.memory_space<vmem>>, vector<32x128xbf16>
    %cst_58 = arith.constant dense<0.000000e+00> : vector<16x128xf32>
    %172 = tpu.matmul %170, %171, %cst_58 {dimension_numbers = #tpu.dot_dimension_numbers<[1], [0], [0], [1], [0, 0, 1, 1], [], []>} : vector<16x32xbf16>, vector<32x128xbf16>, vector<16x128xf32> -> vector<16x128xf32>
    %c0_59 = arith.constant 0 : index
    %c0_60 = arith.constant 0 : index
    %173 = vector.load %arg12[%c0_59, %c0_60] : memref<1x128xf32, #tpu.memory_space<vmem>>, vector<1x128xf32>
    %174 = vector.broadcast %173 : vector<1x128xf32> to vector<16x128xf32>
    %175 = arith.addf %172, %174 : vector<16x128xf32>
    %cst_61 = arith.constant 5.000000e-01 : f32
    %176 = vector.broadcast %cst_61 : f32 to vector<16x128xf32>
    %177 = arith.mulf %176, %175 : vector<16x128xf32>
    %178 = arith.mulf %175, %175 : vector<16x128xf32>
    %179 = arith.mulf %175, %178 : vector<16x128xf32>
    %cst_62 = arith.constant 4.471500e-02 : f32
    %180 = vector.broadcast %cst_62 : f32 to vector<16x128xf32>
    %181 = arith.mulf %180, %179 : vector<16x128xf32>
    %182 = arith.addf %175, %181 : vector<16x128xf32>
    %cst_63 = arith.constant 0.797884583 : f32
    %183 = vector.broadcast %cst_63 : f32 to vector<16x128xf32>
    %184 = arith.mulf %183, %182 : vector<16x128xf32>
    %185 = math.tanh %184 : vector<16x128xf32>
    %cst_64 = arith.constant 1.000000e+00 : f32
    %186 = vector.broadcast %cst_64 : f32 to vector<16x128xf32>
    %187 = arith.addf %186, %185 : vector<16x128xf32>
    %188 = arith.mulf %177, %187 : vector<16x128xf32>
    %189 = arith.truncf %188 : vector<16x128xf32> to vector<16x128xbf16>
    %c0_65 = arith.constant 0 : index
    %c0_66 = arith.constant 0 : index
    %190 = vector.load %arg13[%c0_65, %c0_66] : memref<128x32xbf16, #tpu.memory_space<vmem>>, vector<128x32xbf16>
    %cst_67 = arith.constant dense<0.000000e+00> : vector<16x32xf32>
    %191 = tpu.matmul %189, %190, %cst_67 {dimension_numbers = #tpu.dot_dimension_numbers<[1], [0], [0], [1], [0, 0, 1, 1], [], []>} : vector<16x128xbf16>, vector<128x32xbf16>, vector<16x32xf32> -> vector<16x32xf32>
    %192 = arith.addf %145, %191 : vector<16x32xf32>
    %c0_68 = arith.constant 0 : index
    %c0_69 = arith.constant 0 : index
    %193 = vector.load %arg14[%c0_68, %c0_69] : memref<1x32xf32, #tpu.memory_space<vmem>>, vector<1x32xf32>
    %194 = vector.broadcast %193 : vector<1x32xf32> to vector<16x32xf32>
    %195 = arith.addf %192, %194 : vector<16x32xf32>
    %c0_70 = arith.constant 0 : index
    %c0_71 = arith.constant 0 : index
    %c0_72 = arith.constant 0 : index
    %196 = vector.load %arg15[%c0_70, %c0_71, %c0_72] : memref<1x16x32xf32, #tpu.memory_space<vmem>>, vector<1x16x32xf32>
    %197 = vector.shape_cast %196 : vector<1x16x32xf32> to vector<16x32xf32>
    %198 = vector.shape_cast %195 : vector<16x32xf32> to vector<1x16x32xf32>
    tpu.vector_store %arg15[%c0_70, %c0_71, %c0_72], %198 {strides = array<i32>} : memref<1x16x32xf32, #tpu.memory_space<vmem>>, vector<1x16x32xf32>,
    return
  }
  func.func @transform_0(%arg0: i32) -> (i32, i32, i32) {
    %c0_i32 = arith.constant 0 : i32
    %c0_i32_0 = arith.constant 0 : i32
    %c0_i32_1 = arith.constant 0 : i32
    return %arg0, %c0_i32, %c0_i32_0 : i32, i32, i32
  }
  func.func @transform_1(%arg0: i32) -> (i32, i32, i32) {
    %c0_i32 = arith.constant 0 : i32
    %c0_i32_0 = arith.constant 0 : i32
    %c0_i32_1 = arith.constant 0 : i32
    return %arg0, %c0_i32, %c0_i32_0 : i32, i32, i32
  }
  func.func @transform_2(%arg0: i32) -> (i32, i32) {
    %c0_i32 = arith.constant 0 : i32
    %c0_i32_0 = arith.constant 0 : i32
    %c0_i32_1 = arith.constant 0 : i32
    return %c0_i32, %c0_i32_0 : i32, i32
  }
  func.func @transform_3(%arg0: i32) -> (i32, i32) {
    %c0_i32 = arith.constant 0 : i32
    %c0_i32_0 = arith.constant 0 : i32
    %c0_i32_1 = arith.constant 0 : i32
    return %c0_i32, %c0_i32_0 : i32, i32
  }
  func.func @transform_4(%arg0: i32) -> (i32, i32) {
    %c0_i32 = arith.constant 0 : i32
    %c0_i32_0 = arith.constant 0 : i32
    %c0_i32_1 = arith.constant 0 : i32
    return %c0_i32, %c0_i32_0 : i32, i32
  }
  func.func @transform_5(%arg0: i32) -> (i32, i32) {
    %c0_i32 = arith.constant 0 : i32
    %c0_i32_0 = arith.constant 0 : i32
    %c0_i32_1 = arith.constant 0 : i32
    return %c0_i32, %c0_i32_0 : i32, i32
  }
  func.func @transform_6(%arg0: i32) -> (i32, i32) {
    %c0_i32 = arith.constant 0 : i32
    %c0_i32_0 = arith.constant 0 : i32
    %c0_i32_1 = arith.constant 0 : i32
    return %c0_i32, %c0_i32_0 : i32, i32
  }
  func.func @transform_7(%arg0: i32) -> (i32, i32) {
    %c0_i32 = arith.constant 0 : i32
    %c0_i32_0 = arith.constant 0 : i32
    %c0_i32_1 = arith.constant 0 : i32
    return %c0_i32, %c0_i32_0 : i32, i32
  }
  func.func @transform_8(%arg0: i32) -> (i32, i32) {
    %c0_i32 = arith.constant 0 : i32
    %c0_i32_0 = arith.constant 0 : i32
    %c0_i32_1 = arith.constant 0 : i32
    return %c0_i32, %c0_i32_0 : i32, i32
  }
  func.func @transform_9(%arg0: i32) -> (i32, i32) {
    %c0_i32 = arith.constant 0 : i32
    %c0_i32_0 = arith.constant 0 : i32
    %c0_i32_1 = arith.constant 0 : i32
    return %c0_i32, %c0_i32_0 : i32, i32
  }
  func.func @transform_10(%arg0: i32) -> (i32, i32) {
    %c0_i32 = arith.constant 0 : i32
    %c0_i32_0 = arith.constant 0 : i32
    %c0_i32_1 = arith.constant 0 : i32
    return %c0_i32, %c0_i32_0 : i32, i32
  }
  func.func @transform_11(%arg0: i32) -> (i32, i32) {
    %c0_i32 = arith.constant 0 : i32
    %c0_i32_0 = arith.constant 0 : i32
    %c0_i32_1 = arith.constant 0 : i32
    return %c0_i32, %c0_i32_0 : i32, i32
  }
  func.func @transform_12(%arg0: i32) -> (i32, i32) {
    %c0_i32 = arith.constant 0 : i32
    %c0_i32_0 = arith.constant 0 : i32
    %c0_i32_1 = arith.constant 0 : i32
    return %c0_i32, %c0_i32_0 : i32, i32
  }
  func.func @transform_13(%arg0: i32) -> (i32, i32) {
    %c0_i32 = arith.constant 0 : i32
    %c0_i32_0 = arith.constant 0 : i32
    %c0_i32_1 = arith.constant 0 : i32
    return %c0_i32, %c0_i32_0 : i32, i32
  }
  func.func @transform_14(%arg0: i32) -> (i32, i32, i32) {
    %c0_i32 = arith.constant 0 : i32
    %c0_i32_0 = arith.constant 0 : i32
    %c0_i32_1 = arith.constant 0 : i32
    return %arg0, %c0_i32, %c0_i32_0 : i32, i32, i32
  }
}

</mosaic_0001>

<bundles_post_ra>
// kernel: locker_forward.5
= control target key start
LH: loop header
LB: loop body
LE: loop exit
PB: predicated region body
PF: predicated region fallthrough
CT: control target
= control target key end

     0   :  { %vm28_vm0 = vcmask 261120   ;;  %v128_v2 = vmov 0.0   ;;  %vm129_vm1 = vmmov 0   ;;  %s175_s0 = inlined_call_operand.vmem [shape: f32[2,32], index: 0, kind: input, shape index: {}]   ;;  %s176_s1 = inlined_call_operand.vmem [shape: f32[12,32], index: 1, kind: input, shape index: {}]   ;;  %s177_s2 = inlined_call_operand.vmem [shape: f32[1,12], index: 2, kind: input, shape index: {}]   ;;  %s178_s3 = inlined_call_operand.hbm [shape: f32[2,12], index: 3, kind: output, shape index: {}]  }
   0x1   :  { %v18_v0 = vld [vmem:[%s176_s1] sm:$0xff]  ;;  %v19_v1 = vld [vmem:[%s176_s1 + $0x8] sm:$0xf]  ;;  %95 = vmatprep.subr.bf16.mxu0 %v128_v2  ;;  %97 = vmatprep.mubr.msk.bf16.mxu0 %vm129_vm1, %v128_v2 }
   0x2   :  { %v20_v3 = vpack.c.bf16 %v19_v1, %v18_v0 }
   0x3   :  { %8 = vsyncpa [#allocation3], 0  ;;  %v16_v5 = vld [vmem:[%s175_s0] sm:$0x3]  ;;  %s130_s1 = smov [#allocation2]   ;;  %vm75_vm2 = vcmask 91136  }
   0x4   :  { %v33_v4 = vsel %vm28_vm0, %v20_v3, 0  ;;  %v17_v6 = vpack.c.bf16 %v16_v5, %v16_v5  ;;  %v91_v7 = vld [vmem:[%s177_s2] ss:$0 sm:$0xff]  ;;  %s83_s20 = sshll.u32 %s130_s1, 4  ;;  %s84_s20 = int_to_ptr.vmem [resolvable:$true] %s83_s20 }
   0x5   :  { %96 = vmatpush3.bf16.xpose.msra.mxu0 %v33_v4  ;;  %s104_s21 = scalar_lea.vmem %s84_s20, 32  ;;  %p109_p1 = scmp.lt.s32.totalorder %s84_s20, %s84_s20 }
   0x6   :  { %p105_p0 = scmp.ne.s32.totalorder %s84_s20, %s104_s21  ;;  %p110_p2 = scmp.lt.s32.totalorder %s104_s21, %s104_s21 }
   0x8   :  { %p111_p3 = por %p110_p2, %p109_p1 }
   0xa   :  { %p112_p4 = pnand %p111_p3, %p105_p0 }
   0xc   :  { %98 = vmatmul.mubr.msk.bf16.vlgmr.msra.gmra.mrb[0].mxu0 %vm28_vm0, %v17_v6 }
  0xdf   :  { %v69_v8 = vpop.f32.mrb[0].mxu0 }
  0xe0   :  { %v70_v9 = vadd.f32 %v91_v7, %v69_v8  ;;  %v99_v10 = vpop.f32.mrb[1].mxu0 }
  0xe1   :  { %v72_v11 = vpop.f32.mrb[2].mxu0 }
  0xe2   :  { %v100_v12 = vpop.f32.mrb[3].mxu0  ;;  %76 = vst.msk [vmem:[#allocation2] sm:$0x3] %vm75_vm2, %v70_v9 }
  0xe3   :  { %115 = shalt.err (!%p112_p4)
}
  0xe4   :  { %s116_s2 = scalar_lea.hbm %s178_s3, 32 }
  0xe5   :  { %p117_p5 = scmp.ne.s32.totalorder %s178_s3, %s116_s2  ;;  %p120_p6 = scmp.lt.u32.totalorder %s116_s2, %s178_s3 }
  0xe7   :  { %p122_p7 = pnand %p120_p6, %p117_p5 }
  0xe9   :  { %125 = shalt.err (!%p122_p7)
}
  0xea   :  { %86 = dma.vmem_to_hbm [thread:$0]  %s84_s20, 32, %s178_s3, [#allocation3]  }
  0xeb   :  { %126 = dma.done.wait [#allocation3], 32  }
  0xec   :  { %127 = vsyncadd [#allocation3], 4294967264 }
  0xed   :  { %90 = vsyncpa [#allocation3], 1 }

// kernel: locker_forward.3
= control target key start
LH: loop header
LB: loop body
LE: loop exit
PB: predicated region body
PF: predicated region fallthrough
CT: control target
= control target key end

     0   :  { %s1914_s29 = smov 0   ;;  %s2155_s0 = inlined_call_operand.vmem [shape: f32[2,16,32], index: 0, kind: input, shape index: {}]   ;;  %s2156_s1 = inlined_call_operand.vmem [shape: s32[2,1,16], index: 1, kind: input, shape index: {}]   ;;  %s2157_s2 = inlined_call_operand.vmem [shape: f32[1,32], index: 2, kind: input, shape index: {}]   ;;  %s2158_s3 = inlined_call_operand.vmem [shape: f32[1,32], index: 3, kind: input, shape index: {}]   ;;  %s2159_s4 = inlined_call_operand.vmem [shape: bf16[32,96], index: 4, kind: input, shape index: {}]   ;;  %s2160_s5 = inlined_call_operand.vmem [shape: f32[1,96], index: 5, kind: input, shape index: {}]   ;;  %s2161_s6 = inlined_call_operand.vmem [shape: bf16[32,32], index: 6, kind: input, shape index: {}]   ;;  %s2162_s7 = inlined_call_operand.vmem [shape: f32[1,32], index: 7, kind: input, shape index: {}]   ;;  %s2163_s8 = inlined_call_operand.vmem [shape: f32[1,32], index: 8, kind: input, shape index: {}]   ;;  %s2164_s9 = inlined_call_operand.vmem [shape: f32[1,32], index: 9, kind: input, shape index: {}]   ;;  %s2165_s10 = inlined_call_operand.vmem [shape: bf16[32,128], index: 10, kind: input, shape index: {}]   ;;  %s2166_s11 = inlined_call_operand.vmem [shape: f32[1,128], index: 11, kind: input, shape index: {}]   ;;  %s2167_s12 = inlined_call_operand.vmem [shape: bf16[128,32], index: 12, kind: input, shape index: {}]   ;;  %s2168_s13 = inlined_call_operand.vmem [shape: f32[1,32], index: 13, kind: input, shape index: {}]   ;;  %s2169_s14 = inlined_call_operand.vmem [shape: f32[2,16,32], index: 14, kind: output, shape index: {}]  }
   0x1 LB: > { %s1542_s30 = sadd.s32 4294967295, %s1820_s29   ;;  %p1546_p0 = scmp.ge.s32.totalorder %s1820_s29, 1  ;;  %s1820_s29 = sphi %s1914_s29, %s24_s29  }
   0x2   : > { %p420_p1 = scmp.lt.s32.totalorder %s1820_s29, 3 }
   0x4   : > { %p421_p2 = pnand %p1546_p0, %p420_p1 }
   0x5   : > { %p469_p3 = scmp.lt.s32.totalorder (!%p421_p2), %s1542_s30, 1  ;;  %vm485_vm0 = vcmask (!%p421_p2), 261120   ;;  %v1756_v14 = vld [vmem:[%s2159_s4] sm:$0xff] (!%p421_p2)   ;;  %v1822_v15 = vmov (!%p421_p2), 0.0   ;;  %v1757_v16 = vld [vmem:[%s2159_s4 + $0x8] sm:$0xff] (!%p421_p2)   ;;  %vm1823_vm1 = vmmov (!%p421_p2), 0   ;;  %v602_v53 = vlaneseq (!%p421_p2) }
   0x6   : > { %424 = sbr.rel (%p421_p2) target bundleno = 2567 (0xa07), region = 76  ;;  %1624 = vmatprep.subr.bf16.mxu0 (!%p421_p2), %v1822_v15  ;;  %1644 = vmatprep.subr.bf16.mxu1 (!%p421_p2), %v1822_v15  ;;  %v1551_v25 = vld [vmem:[%s2157_s2] ss:$0 sm:$0xff] (!%p421_p2)  ;;  %s1824_s16 = smov (!%p421_p2), 88   ;;  %vm626_vm2 = vcmask (!%p421_p2), 64512   ;;  %v1831_v59 = vmov (!%p421_p2), 0  }
   0x7   : > { %1625 = vmatpush3.bf16.msra.mxu0 (!%p421_p2), %v1756_v14  ;;  %1628 = vmatprep.mubr.msk.bf16.mxu0 (!%p421_p2), %vm1823_vm1, %v1822_v15  ;;  %v1552_v29 = vld [vmem:[%s2158_s3] ss:$0 sm:$0xff] (!%p421_p2)  ;;  %s1825_s17 = smov (!%p421_p2), 96   ;;  %s1827_s19 = smov (!%p421_p2), 112   ;;  %v603_v55 = vshrl.u32 (!%p421_p2), %v602_v53, 7  ;;  %v611_v56 = vand.u32 (!%p421_p2), 127, %v602_v53 }
   0x8   : > { %1626 = vmatprep.subr.bf16.mxu0 (!%p421_p2), %v1822_v15  ;;  %1646 = vmatprep.mubr.msk.bf16.mxu1 (!%p421_p2), %vm1823_vm1, %v1822_v15  ;;  %v1553_v34 = vld [vmem:[%s2160_s5] ss:$0 sm:$0xff] (!%p421_p2)  ;;  %s1828_s20 = smov (!%p421_p2), 80   ;;  %s1829_s21 = smov (!%p421_p2), 104   ;;  %vm678_vm5 = vcmask (!%p421_p2), 130048   ;;  %vm1154_vm10 = vcmask (!%p421_p2), 195584  }
   0x9   : > { %s1830_s22 = smov (!%p421_p2), 72   ;;  %v609_v57 = vadd.s32 (!%p421_p2), 8, %v603_v55  ;;  %v604_v58 = vsub.s32 (!%p421_p2), 0, %v603_v55  ;;  %v612_v61 = vsub.s32 (!%p421_p2), %v611_v56, %v603_v55  ;;  %s1832_s26 = smov (!%p421_p2), 64  }
   0xa   : > { %s1833_s27 = smov (!%p421_p2), 48   ;;  %s1834_s28 = smov (!%p421_p2), 40  }
   0xb   : > { %1627 = vmatpush3.bf16.msra.mxu0 (!%p421_p2), %v1757_v16  ;;  %v613_v62 = vsub.s32 (!%p421_p2), %v611_v56, %v609_v57  ;;  %s1838_s23 = smov (!%p421_p2), 24  }
   0xc   : > { %1632 = vmatprep.subr.bf16.mxu0 (!%p421_p2), %v1822_v15 }
   0xd   : > { %s2175_s30 = smov (!%p469_p3, %s1542_s30), 1 }
   0xe   : > { %s1588_s15 = sshll.u32 %s2175_s30, 4  ;;  %s476_s25 = scalar_lea.vmem %s2156_s1, %s2175_s30 }
   0xf   : > { %s473_s18 = scalar_lea.vmem %s2155_s0, %s1588_s15  ;;  %v599_v54 = vld [vmem:[%s476_s25] sm:$0x1] }
  0x10   : > { %v1930_v0 = vld [vmem:[%s473_s18] sm:$0xff]  ;;  %v1932_v1 = vld [vmem:[%s473_s18 + $0x8] sm:$0xff]  ;;  %s1826_s18 = smov 120   ;;  %vm600_vm3 = vcmp.ne.s32.totalorder %v599_v54, 0 }
  0x11   : > { %v486_v2 = vsel %vm485_vm0, %v1930_v0, 0.0  ;;  %v489_v3 = vsel %vm485_vm0, %v1932_v1, 0.0  ;;  %v601_v60 = vsel %vm600_vm3, 1, %v1831_v59 }
  0x12   : > { %487 = vadd.xlane.f32.xlu0 %v486_v2  ;;  %v605_v63 = vrot.slane %v601_v60, %v604_v58  ;;  %v615_v2 = vsub.s32 0, %v612_v61 }
  0x14   : > { %vm606_vm4 = vcmp.eq.s32.totalorder %v605_v63, 1 }
  0x16   : > { %490 = vadd.xlane.f32.xlu0 %v489_v3  ;;  %v618_v3 = vsub.s32 0, %v613_v62 }
  0x9f   : > { %v488_v4 = vpop.xlane.xlu0 %487 }
  0xa0   : > { %v493_v5 = vmul.f32 0.03125, %v488_v4 }
  0xa2   : > { %v495_v6 = vsub.f32 %v1930_v0, %v493_v5 }
  0xa3   : > { %v491_v7 = vpop.xlane.xlu0 %490 }
  0xa4   : > { %v494_v8 = vmul.f32 0.03125, %v491_v7  ;;  %v497_v9 = vmul.f32 %v495_v6, %v495_v6 }
  0xa6   : > { %v496_v10 = vsub.f32 %v1932_v1, %v494_v8  ;;  %v499_v11 = vsel %vm485_vm0, %v497_v9, 0.0 }
  0xa7   : > { %500 = vadd.xlane.f32.xlu1 %v499_v11 }
  0xa8   : > { %v498_v12 = vmul.f32 %v496_v10, %v496_v10 }
  0xaa   : > { %v502_v13 = vsel %vm485_vm0, %v498_v12, 0.0 }
  0xab   : > { %503 = vadd.xlane.f32.xlu1 %v502_v13 }
 0x134   : > { %v501_v17 = vpop.xlane.xlu1 %500 }
 0x135   : > { %v505_v18 = vmul.f32 0.03125, %v501_v17 }
 0x137   : > { %v507_v19 = vadd.f32 1e-06, %v505_v18  ;;  %v1558_v18 = vmin.u32 %v618_v3, %v613_v62 }
 0x138   : > { %v504_v20 = vpop.xlane.xlu1 %503 }
 0x139   : > { %1770 = vrsqrt.f32 %v507_v19  ;;  %v506_v21 = vmul.f32 0.03125, %v504_v20  ;;  %vm621_vm7 = vcmp.le.s32.totalorder %v1558_v18, 2 }
 0x13a   : > { %vm2015_vm9 = vmand %vm606_vm4, %vm621_vm7 }
 0x13b   : > { %v508_v22 = vadd.f32 1e-06, %v506_v21 }
 0x13d   : > { %1772 = vrsqrt.f32 %v508_v22 }
 0x143   : > { %v1771_v23 = vpop.eup %1770 }
 0x144   : > { %v511_v24 = vmul.f32 %v1771_v23, %v495_v6 }
 0x146   : > { %v520_v28 = vmul.f32 %v1551_v25, %v511_v24 }
 0x147   : > { %v1773_v26 = vpop.eup %1772 }
 0x148   : > { %v512_v27 = vmul.f32 %v1773_v26, %v496_v10  ;;  %v529_v31 = vadd.f32 %v1552_v29, %v520_v28  ;;  %v1557_v10 = vmin.u32 %v615_v2, %v612_v61 }
 0x14a   : > { %v521_v30 = vmul.f32 %v1551_v25, %v512_v27  ;;  %vm620_vm6 = vcmp.le.s32.totalorder %v1557_v10, 2 }
 0x14b   : > { %vm2009_vm8 = vmand %vm606_vm4, %vm620_vm6 }
 0x14c   : > { %v530_v32 = vadd.f32 %v1552_v29, %v521_v30 }
 0x14e   : > { %v531_v33 = vpack.c.bf16 %v530_v32, %v529_v31 }
 0x150   : > { %1629 = vmatmul.mubr.msk.bf16.vlgmr.msra.gmra.mrb[0].mxu0 %vm485_vm0, %v531_v33 }
 0x151   : > { %1634 = vmatprep.mubr.msk.bf16.mxu0 %vm1823_vm1, %v1822_v15 }
 0x223   : > { %v592_v35 = vpop.f32.mrb[0].mxu0 }
 0x224   : > { %v1630_v36 = vpop.f32.mrb[1].mxu0  ;;  %v593_v38 = vadd.f32 %v1553_v34, %v592_v35 }
 0x225   : > { %v595_v37 = vpop.f32.mrb[2].mxu0 }
 0x226   : > { %v596_v39 = vadd.f32 %v1553_v34, %v595_v37  ;;  %v1631_v40 = vpop.f32.mrb[3].mxu0 }
 0x228   : > { %v1968_v41 = vpack.c.bf16 %v596_v39, %v593_v38 }
 0x22a   : > { %751 = vrot.lane.b32.xlu1 %v1968_v41, %s1824_s16  ;;  %624 = vrot.lane.b32.xlu0 %v1968_v41, %s1825_s17  ;;  %s1835_s16 = smov 56   ;;  %s481_s17 = scalar_lea.vmem %s2169_s14, %s1588_s15 }
 0x22e   : > { %749 = vrot.lane.b32.xlu1 %v1968_v41, %s1826_s18  ;;  %874 = vrot.lane.b32.xlu0 %v1968_v41, %s1827_s19  ;;  %s1836_s19 = smov 8  }
 0x232   : > { %876 = vrot.lane.b32.xlu1 %v1968_v41, %s1828_s20  ;;  %1001 = vrot.lane.b32.xlu0 %v1968_v41, %s1829_s21 }
 0x236   : > { %1003 = vrot.lane.b32.xlu1 %v1968_v41, %s1830_s22  ;;  %s1837_s22 = smov 16  }
 0x29c   : > { %v752_v42 = vpop.permute.xlu1 %751  ;;  %v625_v43 = vpop.permute.xlu0 %624 }
 0x29d   : > { %v631_v44 = vsel %vm626_vm2, %v625_v43, 0  ;;  %v757_v45 = vsel %vm626_vm2, %v752_v42, 0 }
 0x29e   : > { %1633 = vmatpush3.bf16.xpose.msra.mxu0 %v631_v44  ;;  %1645 = vmatpush3.bf16.xpose.msra.mxu1 %v757_v45 }
 0x29f   : > { %1656 = vmatprep.subr.bf16.mxu1 %v1822_v15  ;;  %1638 = vmatprep.subr.bf16.mxu0 %v1822_v15 }
 0x2a0   : > { %v750_v46 = vpop.permute.xlu1 %749  ;;  %v875_v50 = vpop.permute.xlu0 %874 }
 0x2a4   : > { %v877_v47 = vpop.permute.xlu1 %876  ;;  %v1002_v52 = vpop.permute.xlu0 %1001 }
 0x2a5   : > { %v882_v48 = vsel %vm626_vm2, %v877_v47, 0  ;;  %1635 = vmatmul.mubr.msk.bf16.vlgmr.msra.gmra.mrb[4].mxu0 %vm626_vm2, %v1968_v41  ;;  %1647 = vmatmul.mubr.msk.bf16.vlgmr.msra.gmra.mrb[0].mxu1 %vm626_vm2, %v750_v46 }
 0x2a6   : > { %1657 = vmatpush3.bf16.xpose.msra.mxu1 %v882_v48  ;;  %1658 = vmatprep.mubr.msk.bf16.mxu1 %vm1823_vm1, %v1822_v15 }
 0x2a7   : > { %1668 = vmatprep.subr.bf16.mxu1 %v1822_v15  ;;  %1640 = vmatprep.mubr.msk.bf16.mxu0 %vm1823_vm1, %v1822_v15 }
 0x2a8   : > { %v1004_v49 = vpop.permute.xlu1 %1003 }
 0x2a9   : > { %v1009_v51 = vsel %vm626_vm2, %v1004_v49, 0 }
 0x2ad   : > { %1659 = vmatmul.mubr.msk.bf16.vlgmr.msra.gmra.mrb[4].mxu1 %vm626_vm2, %v875_v50 }
 0x2ae   : > { %1669 = vmatpush3.bf16.xpose.msra.mxu1 %v1009_v51  ;;  %1670 = vmatprep.mubr.msk.bf16.mxu1 %vm1823_vm1, %v1822_v15 }
 0x2af   : > { %1680 = vmatprep.subr.bf16.mxu1 %v1822_v15 }
 0x2b5   : > { %1671 = vmatmul.mubr.msk.bf16.vlgmr.msra.gmra.mrb[8].mxu1 %vm626_vm2, %v1002_v52 }
 0x2b6   : > { %1684 = vmatprep.mubr.msk.bf16.mxu1 %vm1823_vm1, %v1822_v15 }
 0x378   : > { %v667_v4 = vpop.f32.mrb[4].mxu0  ;;  %v793_v5 = vpop.f32.mrb[0].mxu1 }
 0x379   : > { %v674_v6 = vmul.f32 0.35355338, %v667_v4  ;;  %v800_v7 = vmul.f32 0.35355338, %v793_v5  ;;  %v1636_v8 = vpop.f32.mrb[5].mxu0  ;;  %v1648_v9 = vpop.f32.mrb[1].mxu1 }
 0x37a   : > { %v670_v11 = vpop.f32.mrb[6].mxu0  ;;  %v796_v12 = vpop.f32.mrb[2].mxu1 }
 0x37b   : > { %v675_v13 = vmul.f32 0.35355338, %v670_v11  ;;  %v801_v14 = vmul.f32 0.35355338, %v796_v12  ;;  %v1637_v16 = vpop.f32.mrb[7].mxu0  ;;  %v1649_v17 = vpop.f32.mrb[3].mxu1 }
 0x37c   : > { %v676_v19 = vsel %vm606_vm4, %v674_v6, -1e+09  ;;  %v802_v20 = vsel %vm606_vm4, %v800_v7, -1e+09 }
 0x37d   : > { %v679_v21 = vsel %vm678_vm5, %v676_v19, -inf  ;;  %v677_v22 = vsel %vm606_vm4, %v675_v13, -1e+09  ;;  %v803_v23 = vsel %vm606_vm4, %v801_v14, -1e+09  ;;  %v804_v30 = vsel %vm678_vm5, %v802_v20, -inf }
 0x37e   : > { %680 = vmax.xlane.f32.xlu1 %v679_v21  ;;  %v682_v24 = vsel %vm678_vm5, %v677_v22, -inf  ;;  %v807_v37 = vsel %vm678_vm5, %v803_v23, -inf }
 0x37f   : > { %683 = vmax.xlane.f32.xlu0 %v682_v24 }
 0x380   : > { %v918_v25 = vpop.f32.mrb[4].mxu1 }
 0x381   : > { %v925_v27 = vmul.f32 0.35355338, %v918_v25  ;;  %v1660_v28 = vpop.f32.mrb[5].mxu1 }
 0x382   : > { %v921_v29 = vpop.f32.mrb[6].mxu1 }
 0x383   : > { %v926_v32 = vmul.f32 0.35355338, %v921_v29  ;;  %v1661_v33 = vpop.f32.mrb[7].mxu1  ;;  %805 = vmax.xlane.f32.xlu0 %v804_v30  ;;  %v929_v34 = vsel %vm2009_vm8, %v925_v27, -1e+09 }
 0x384   : > { %v931_v35 = vsel %vm678_vm5, %v929_v34, -inf }
 0x385   : > { %932 = vmax.xlane.f32.xlu1 %v931_v35  ;;  %v930_v36 = vsel %vm2015_vm9, %v926_v32, -1e+09 }
 0x386   : > { %v934_v43 = vsel %vm678_vm5, %v930_v36, -inf }
 0x387   : > { %808 = vmax.xlane.f32.xlu0 %v807_v37 }
 0x388   : > { %v1045_v38 = vpop.f32.mrb[8].mxu1 }
 0x389   : > { %v1052_v39 = vmul.f32 0.35355338, %v1045_v38  ;;  %v1672_v40 = vpop.f32.mrb[9].mxu1 }
 0x38a   : > { %v1048_v42 = vpop.f32.mrb[10].mxu1 }
 0x38b   : > { %v1053_v44 = vmul.f32 0.35355338, %v1048_v42  ;;  %v1673_v45 = vpop.f32.mrb[11].mxu1  ;;  %935 = vmax.xlane.f32.xlu0 %v934_v43  ;;  %v1054_v46 = vsel %vm2009_vm8, %v1052_v39, -1e+09 }
 0x38c   : > { %v1056_v47 = vsel %vm678_vm5, %v1054_v46, -inf }
 0x38d   : > { %1057 = vmax.xlane.f32.xlu1 %v1056_v47  ;;  %v1055_v48 = vsel %vm2015_vm9, %v1053_v44, -1e+09 }
 0x38e   : > { %v1059_v49 = vsel %vm678_vm5, %v1055_v48, -inf }
 0x38f   : > { %1060 = vmax.xlane.f32.xlu0 %v1059_v49 }
 0x39e   : > { %702 = vrot.lane.b32.xlu1 %v1968_v41, %s1832_s26 }
 0x40b   : > { %v681_v50 = vpop.xlane.xlu1 %680 }
 0x40c   : > { %v685_v51 = vsub.f32 %v676_v19, %v681_v50  ;;  %v684_v52 = vpop.xlane.xlu0 %683 }
 0x40d   : > { %v686_v53 = vsub.f32 %v677_v22, %v684_v52 }
 0x40e   : > { %v687_v54 = vmul.f32 1.442695, %v685_v51 }
 0x40f   : > { %v689_v55 = vmul.f32 1.442695, %v686_v53 }
 0x410   : > { %1774 = vpow2.f32 %v687_v54  ;;  %v806_v56 = vpop.xlane.xlu0 %805 }
 0x411   : > { %1776 = vpow2.f32 %v689_v55  ;;  %v810_v57 = vsub.f32 %v802_v20, %v806_v56 }
 0x412   : > { %v933_v58 = vpop.xlane.xlu1 %932 }
 0x413   : > { %v812_v59 = vmul.f32 1.442695, %v810_v57  ;;  %v937_v60 = vsub.f32 %v929_v34, %v933_v58 }
 0x414   : > { %v809_v61 = vpop.xlane.xlu0 %808 }
 0x415   : > { %1778 = vpow2.f32 %v812_v59  ;;  %v939_v62 = vmul.f32 1.442695, %v937_v60  ;;  %v811_v63 = vsub.f32 %v803_v23, %v809_v61 }
 0x417   : > { %1780 = vpow2.f32 %v939_v62  ;;  %v814_v2 = vmul.f32 1.442695, %v811_v63 }
 0x418   : > { %v936_v3 = vpop.xlane.xlu0 %935 }
 0x419   : > { %1782 = vpow2.f32 %v814_v2  ;;  %v938_v4 = vsub.f32 %v930_v36, %v936_v3 }
 0x41a   : > { %v1775_v5 = vpop.eup %1774  ;;  %v1058_v6 = vpop.xlane.xlu1 %1057 }
 0x41b   : > { %v1777_v7 = vpop.eup %1776  ;;  %v941_v8 = vmul.f32 1.442695, %v938_v4  ;;  %v1062_v9 = vsub.f32 %v1054_v46, %v1058_v6  ;;  %v691_v10 = vsel %vm678_vm5, %v1775_v5, 0.0  ;;  %v1758_v6 = vld [vmem:[%s2161_s6] sm:$0xff]  }
 0x41c   : > { %692 = vadd.xlane.f32.xlu1 %v691_v10  ;;  %v1061_v11 = vpop.xlane.xlu0 %1060  ;;  %v694_v12 = vsel %vm678_vm5, %v1777_v7, 0.0  ;;  %1681 = vmatpush3.bf16.msra.mxu1 %v1758_v6 }
 0x41d   : > { %1784 = vpow2.f32 %v941_v8  ;;  %v1064_v13 = vmul.f32 1.442695, %v1062_v9  ;;  %v1063_v14 = vsub.f32 %v1055_v48, %v1061_v11  ;;  %695 = vadd.xlane.f32.xlu0 %v694_v12  ;;  %1682 = vmatprep.subr.bf16.mxu1 %v1822_v15  ;;  %v1759_v11 = vld [vmem:[%s2161_s6 + $0x8] sm:$0xff]  }
 0x41e   : > { %v703_v16 = vpop.permute.xlu1 %702 }
 0x41f   : > { %v1779_v17 = vpop.eup %1778  ;;  %1786 = vpow2.f32 %v1064_v13  ;;  %v1066_v18 = vmul.f32 1.442695, %v1063_v14  ;;  %1639 = vmatpush3.bf16.msra.mxu0 %v703_v16 }
 0x420   : > { %v816_v19 = vsel %vm678_vm5, %v1779_v17, 0.0  ;;  %1650 = vmatprep.subr.bf16.mxu0 %v1822_v15  ;;  %1683 = vmatpush3.bf16.msra.mxu1 %v1759_v11 }
 0x421   : > { %v1781_v20 = vpop.eup %1780  ;;  %1788 = vpow2.f32 %v1066_v18  ;;  %817 = vadd.xlane.f32.xlu1 %v816_v19  ;;  %1696 = vmatprep.subr.bf16.mxu1 %v1822_v15 }
 0x422   : > { %v943_v22 = vsel %vm678_vm5, %v1781_v20, 0.0 }
 0x423   : > { %v1783_v21 = vpop.eup %1782 }
 0x424   : > { %v819_v23 = vsel %vm678_vm5, %v1783_v21, 0.0 }
 0x425   : > { %944 = vadd.xlane.f32.xlu1 %v943_v22  ;;  %820 = vadd.xlane.f32.xlu0 %v819_v23 }
 0x427   : > { %v1785_v24 = vpop.eup %1784 }
 0x428   : > { %v946_v25 = vsel %vm678_vm5, %v1785_v24, 0.0 }
 0x429   : > { %v1787_v26 = vpop.eup %1786  ;;  %947 = vadd.xlane.f32.xlu0 %v946_v25 }
 0x42a   : > { %v1068_v27 = vsel %vm678_vm5, %v1787_v26, 0.0 }
 0x42b   : > { %v1789_v28 = vpop.eup %1788  ;;  %1069 = vadd.xlane.f32.xlu1 %v1068_v27 }
 0x42c   : > { %v1071_v29 = vsel %vm678_vm5, %v1789_v28, 0.0 }
 0x42d   : > { %1072 = vadd.xlane.f32.xlu0 %v1071_v29 }
 0x43c   : > { %954 = vrot.lane.b32.xlu1 %v1968_v41, %s1833_s27 }
 0x440   : > { %1079 = vrot.lane.b32.xlu1 %v1968_v41, %s1834_s28 }
 0x443   : > { %827 = vrot.lane.b32.xlu0 %v1968_v41, %s1835_s16 }
 0x4a9   : > { %v693_v30 = vpop.xlane.xlu1 %692 }
 0x4aa   : > { %1790 = vrcp.f32 %v693_v30  ;;  %v696_v31 = vpop.xlane.xlu0 %695 }
 0x4ab   : > { %1792 = vrcp.f32 %v696_v31 }
 0x4ae   : > { %v818_v32 = vpop.xlane.xlu1 %817 }
 0x4af   : > { %1794 = vrcp.f32 %v818_v32 }
 0x4b2   : > { %v821_v33 = vpop.xlane.xlu0 %820  ;;  %v945_v39 = vpop.xlane.xlu1 %944 }
 0x4b3   : > { %1796 = vrcp.f32 %v821_v33 }
 0x4b4   : > { %v1791_v34 = vpop.eup %1790 }
 0x4b5   : > { %v1793_v35 = vpop.eup %1792  ;;  %v699_v36 = vmul.f32 %v1791_v34, %v1775_v5 }
 0x4b6   : > { %v700_v37 = vmul.f32 %v1793_v35, %v1777_v7  ;;  %v948_v38 = vpop.xlane.xlu0 %947 }
 0x4b7   : > { %1798 = vrcp.f32 %v948_v38  ;;  %v1570_v38 = vld [vmem:[%s2162_s7] ss:$0 sm:$0xff] }
 0x4b8   : > { %v701_v40 = vpack.c.bf16 %v700_v37, %v699_v36  ;;  %1800 = vrcp.f32 %v945_v39  ;;  %v1070_v43 = vpop.xlane.xlu1 %1069 }
 0x4b9   : > { %v1795_v42 = vpop.eup %1794 }
 0x4ba   : > { %1641 = vmatmul.mubr.msk.bf16.vlgmr.msra.gmra.mrb[8].mxu0 %vm678_vm5, %v701_v40  ;;  %v1073_v41 = vpop.xlane.xlu0 %1072  ;;  %v824_v46 = vmul.f32 %v1795_v42, %v1779_v17 }
 0x4bb   : > { %1652 = vmatprep.mubr.msk.bf16.mxu0 %vm1823_vm1, %v1822_v15  ;;  %1802 = vrcp.f32 %v1073_v41 }
 0x4bc   : > { %1804 = vrcp.f32 %v1070_v43  ;;  %v955_v50 = vpop.permute.xlu1 %954 }
 0x4bd   : > { %v1797_v44 = vpop.eup %1796 }
 0x4be   : > { %v828_v45 = vpop.permute.xlu0 %827  ;;  %v825_v47 = vmul.f32 %v1797_v44, %v1783_v21 }
 0x4bf   : > { %1651 = vmatpush3.bf16.msra.mxu0 %v828_v45 }
 0x4c0   : > { %1662 = vmatprep.subr.bf16.mxu0 %v1822_v15  ;;  %v826_v48 = vpack.c.bf16 %v825_v47, %v824_v46  ;;  %v1080_v56 = vpop.permute.xlu1 %1079 }
 0x4c1   : > { %v1799_v49 = vpop.eup %1798 }
 0x4c2   : > { %1653 = vmatmul.mubr.msk.bf16.vlgmr.msra.gmra.mrb[12].mxu0 %vm678_vm5, %v826_v48  ;;  %v1801_v51 = vpop.eup %1800  ;;  %v952_v52 = vmul.f32 %v1799_v49, %v1785_v24 }
 0x4c3   : > { %1663 = vmatpush3.bf16.msra.mxu0 %v955_v50  ;;  %1664 = vmatprep.mubr.msk.bf16.mxu0 %vm1823_vm1, %v1822_v15  ;;  %v951_v53 = vmul.f32 %v1801_v51, %v1781_v20 }
 0x4c4   : > { %1674 = vmatprep.subr.bf16.mxu0 %v1822_v15 }
 0x4c5   : > { %v953_v54 = vpack.c.bf16 %v952_v52, %v951_v53  ;;  %v1803_v55 = vpop.eup %1802 }
 0x4c6   : > { %v1805_v57 = vpop.eup %1804  ;;  %v1077_v58 = vmul.f32 %v1803_v55, %v1789_v28 }
 0x4c7   : > { %v1076_v59 = vmul.f32 %v1805_v57, %v1787_v26  ;;  %v1761_v57 = vld [vmem:[%s2165_s10 + $0x8] sm:$0xff]  }
 0x4c9   : > { %v1078_v60 = vpack.c.bf16 %v1077_v58, %v1076_v59 }
 0x4ca   : > { %1665 = vmatmul.mubr.msk.bf16.vlgmr.msra.gmra.mrb[16].mxu0 %vm678_vm5, %v953_v54 }
 0x4cb   : > { %1675 = vmatpush3.bf16.msra.mxu0 %v1080_v56  ;;  %1676 = vmatprep.mubr.msk.bf16.mxu0 %vm1823_vm1, %v1822_v15  ;;  %v1760_v56 = vld [vmem:[%s2165_s10] sm:$0xff]  }
 0x4cc   : > { %1688 = vmatprep.subr.bf16.mxu0 %v1822_v15 }
 0x4d2   : > { %1677 = vmatmul.mubr.msk.bf16.vlgmr.msra.gmra.mrb[20].mxu0 %vm678_vm5, %v1078_v60 }
 0x4d3   : > { %1692 = vmatprep.mubr.msk.bf16.mxu0 %vm1823_vm1, %v1822_v15  ;;  %1689 = vmatpush3.bf16.msra.mxu0 %v1760_v56 }
 0x4d4   : > { %1690 = vmatprep.subr.bf16.mxu0 %v1822_v15 }
 0x4d7   : > { %1691 = vmatpush3.bf16.msra.mxu0 %v1761_v57 }
 0x58d   : > { %v742_v61 = vpop.f32.mrb[8].mxu0 }
 0x58e   : > { %v1642_v62 = vpop.f32.mrb[9].mxu0 }
 0x58f   : > { %v745_v63 = vpop.f32.mrb[10].mxu0 }
 0x590   : > { %v1643_v2 = vpop.f32.mrb[11].mxu0 }
 0x595   : > { %v867_v3 = vpop.f32.mrb[12].mxu0 }
 0x596   : > { %v1654_v4 = vpop.f32.mrb[13].mxu0 }
 0x597   : > { %v870_v5 = vpop.f32.mrb[14].mxu0  ;;  %v1571_v4 = vld [vmem:[%s2163_s8] ss:$0 sm:$0xff] }
 0x598   : > { %v1741_v7 = vpack.i.bf16 %v870_v5, %v867_v3  ;;  %v1655_v8 = vpop.f32.mrb[15].mxu0 }
 0x599   : > { %v1572_v8 = vld [vmem:[%s2164_s9] ss:$0 sm:$0xff] }
 0x59a   : > { %1742 = vrot.lane.b32.xlu1 %v1741_v7, %s1836_s19 }
 0x59d   : > { %v994_v9 = vpop.f32.mrb[16].mxu0 }
 0x59e   : > { %v1666_v10 = vpop.f32.mrb[17].mxu0 }
 0x59f   : > { %v997_v12 = vpop.f32.mrb[18].mxu0 }
 0x5a0   : > { %v1746_v13 = vpack.i.bf16 %v997_v12, %v994_v9  ;;  %v1667_v14 = vpop.f32.mrb[19].mxu0 }
 0x5a1   : > { %v1763_v14 = vld [vmem:[%s2167_s12 + $0x8] sm:$0xff]  }
 0x5a2   : > { %1747 = vrot.lane.b32.xlu0 %v1746_v13, %s1837_s22  ;;  %v1762_v13 = vld [vmem:[%s2167_s12] sm:$0xff]  }
 0x5a5   : > { %v1119_v16 = vpop.f32.mrb[20].mxu0 }
 0x5a6   : > { %v1678_v17 = vpop.f32.mrb[21].mxu0 }
 0x5a7   : > { %v1122_v18 = vpop.f32.mrb[22].mxu0  ;;  %v1765_v17 = vld [vmem:[%s2167_s12 + $0x18] sm:$0xff]  }
 0x5a8   : > { %v1751_v19 = vpack.i.bf16 %v1122_v18, %v1119_v16  ;;  %v1679_v20 = vpop.f32.mrb[23].mxu0  ;;  %v1764_v16 = vld [vmem:[%s2167_s12 + $0x10] sm:$0xff]   ;;  %v1766_v18 = vld [vmem:[%s2167_s12 + $0x20] sm:$0xff]  }
 0x5a9   : > { %v1768_v20 = vld [vmem:[%s2167_s12 + $0x30] sm:$0xff]  }
 0x5aa   : > { %1752 = vrot.lane.b32.xlu1 %v1751_v19, %s1838_s23  ;;  %v1767_v19 = vld [vmem:[%s2167_s12 + $0x28] sm:$0xff]  }
 0x60c   : > { %v1743_v21 = vpop.permute.xlu1 %1742 }
 0x60d   : > { %v1745_v23 = vunpack.i.h.bf16 %v1743_v21  ;;  %v1744_v24 = vunpack.i.l.bf16 %v1743_v21  ;;  %v1769_v21 = vld [vmem:[%s2167_s12 + $0x38] sm:$0xff]  }
 0x60f   : > { %v1151_v28 = vsel %vm626_vm2, %v745_v63, %v1745_v23  ;;  %v1150_v29 = vsel %vm626_vm2, %v742_v61, %v1744_v24 }
 0x614   : > { %v1748_v22 = vpop.permute.xlu0 %1747 }
 0x615   : > { %v1750_v25 = vunpack.i.h.bf16 %v1748_v22  ;;  %v1749_v26 = vunpack.i.l.bf16 %v1748_v22  ;;  %v1573_v22 = vld [vmem:[%s2166_s11] ss:$0 sm:$0xff] }
 0x617   : > { %v1153_v32 = vsel %vm678_vm5, %v1151_v28, %v1750_v25  ;;  %v1152_v33 = vsel %vm678_vm5, %v1150_v29, %v1749_v26 }
 0x61c   : > { %v1753_v27 = vpop.permute.xlu1 %1752 }
 0x61d   : > { %v1755_v30 = vunpack.i.h.bf16 %v1753_v27  ;;  %v1754_v31 = vunpack.i.l.bf16 %v1753_v27 }
 0x61f   : > { %v1156_v34 = vsel %vm1154_vm10, %v1153_v32, %v1755_v30  ;;  %v1155_v35 = vsel %vm1154_vm10, %v1152_v33, %v1754_v31 }
 0x620   : > { %v1157_v36 = vpack.c.bf16 %v1156_v34, %v1155_v35 }
 0x622   : > { %1685 = vmatmul.mubr.msk.bf16.vlgmr.msra.gmra.mrb[12].mxu1 %vm485_vm0, %v1157_v36 }
 0x623   : > { %1712 = vmatprep.mubr.msk.bf16.mxu1 %vm1823_vm1, %v1822_v15  ;;  %1697 = vmatpush3.bf16.msra.mxu1 %v1762_v13 }
 0x624   : > { %1698 = vmatprep.subr.bf16.mxu1 %v1822_v15 }
 0x627   : > { %1699 = vmatpush3.bf16.msra.mxu1 %v1763_v14 }
 0x628   : > { %1700 = vmatprep.subr.bf16.mxu1 %v1822_v15 }
 0x62b   : > { %1701 = vmatpush3.bf16.msra.mxu1 %v1764_v16 }
 0x62c   : > { %1702 = vmatprep.subr.bf16.mxu1 %v1822_v15 }
 0x62f   : > { %1703 = vmatpush3.bf16.msra.mxu1 %v1765_v17 }
 0x630   : > { %1704 = vmatprep.subr.bf16.mxu1 %v1822_v15 }
 0x633   : > { %1705 = vmatpush3.bf16.msra.mxu1 %v1766_v18 }
 0x634   : > { %1706 = vmatprep.subr.bf16.mxu1 %v1822_v15 }
 0x637   : > { %1707 = vmatpush3.bf16.msra.mxu1 %v1767_v19 }
 0x638   : > { %1708 = vmatprep.subr.bf16.mxu1 %v1822_v15 }
 0x63b   : > { %1709 = vmatpush3.bf16.msra.mxu1 %v1768_v20 }
 0x63c   : > { %1710 = vmatprep.subr.bf16.mxu1 %v1822_v15 }
 0x63f   : > { %1711 = vmatpush3.bf16.msra.mxu1 %v1769_v21 }
 0x6f5   : > { %v1211_v37 = vpop.f32.mrb[12].mxu1 }
 0x6f6   : > { %v1218_v39 = vadd.f32 %v1211_v37, %v1930_v0  ;;  %v1686_v40 = vpop.f32.mrb[13].mxu1 }
 0x6f7   : > { %v1214_v41 = vpop.f32.mrb[14].mxu1 }
 0x6f8   : > { %v2079_v42 = vadd.f32 %v1570_v38, %v1218_v39  ;;  %v1219_v43 = vadd.f32 %v1214_v41, %v1932_v1  ;;  %v1687_v44 = vpop.f32.mrb[15].mxu1 }
 0x6fa   : > { %v2082_v45 = vadd.f32 %v1570_v38, %v1219_v43  ;;  %v1229_v46 = vsel %vm485_vm0, %v2079_v42, 0.0 }
 0x6fb   : > { %1230 = vadd.xlane.f32.xlu0 %v1229_v46 }
 0x6fc   : > { %v1232_v47 = vsel %vm485_vm0, %v2082_v45, 0.0 }
 0x6fd   : > { %1233 = vadd.xlane.f32.xlu1 %v1232_v47 }
 0x788   : > { %v1231_v48 = vpop.xlane.xlu0 %1230 }
 0x789   : > { %v1235_v49 = vmul.f32 0.03125, %v1231_v48 }
 0x78a   : > { %v1234_v0 = vpop.xlane.xlu1 %1233 }
 0x78b   : > { %v1237_v50 = vsub.f32 %v2079_v42, %v1235_v49  ;;  %v1236_v51 = vmul.f32 0.03125, %v1234_v0  ;;  %v1585_v0 = vld [vmem:[%s2168_s13] ss:$0 sm:$0xff] }
 0x78d   : > { %v1238_v52 = vsub.f32 %v2082_v45, %v1236_v51  ;;  %v1239_v1 = vmul.f32 %v1237_v50, %v1237_v50 }
 0x78f   : > { %v1241_v53 = vsel %vm485_vm0, %v1239_v1, 0.0  ;;  %v1240_v54 = vmul.f32 %v1238_v52, %v1238_v52 }
 0x790   : > { %1242 = vadd.xlane.f32.xlu0 %v1241_v53 }
 0x791   : > { %v1244_v55 = vsel %vm485_vm0, %v1240_v54, 0.0 }
 0x794   : > { %1245 = vadd.xlane.f32.xlu0 %v1244_v55 }
 0x81d   : > { %v1243_v58 = vpop.xlane.xlu0 %1242 }
 0x81e   : > { %v1247_v59 = vmul.f32 0.03125, %v1243_v58 }
 0x820   : > { %v1249_v60 = vadd.f32 1e-06, %v1247_v59 }
 0x821   : > { %v1246_v61 = vpop.xlane.xlu0 %1245 }
 0x822   : > { %1806 = vrsqrt.f32 %v1249_v60  ;;  %v1248_v62 = vmul.f32 0.03125, %v1246_v61 }
 0x824   : > { %v1250_v63 = vadd.f32 1e-06, %v1248_v62 }
 0x826   : > { %1808 = vrsqrt.f32 %v1250_v63 }
 0x82c   : > { %v1807_v2 = vpop.eup %1806 }
 0x82d   : > { %v1253_v3 = vmul.f32 %v1807_v2, %v1237_v50 }
 0x82f   : > { %v1262_v6 = vmul.f32 %v1571_v4, %v1253_v3 }
 0x830   : > { %v1809_v5 = vpop.eup %1808 }
 0x831   : > { %v1254_v7 = vmul.f32 %v1809_v5, %v1238_v52  ;;  %v1271_v10 = vadd.f32 %v1572_v8, %v1262_v6 }
 0x833   : > { %v1263_v9 = vmul.f32 %v1571_v4, %v1254_v7 }
 0x835   : > { %v1272_v11 = vadd.f32 %v1572_v8, %v1263_v9 }
 0x837   : > { %v1273_v12 = vpack.c.bf16 %v1272_v11, %v1271_v10 }
 0x839   : > { %1693 = vmatmul.mubr.msk.bf16.vlgmr.msra.gmra.mrb[24].mxu0 %vm485_vm0, %v1273_v12 }
 0x90c   : > { %v1334_v23 = vpop.f32.mrb[24].mxu0 }
 0x90d   : > { %v1335_v24 = vadd.f32 %v1573_v22, %v1334_v23  ;;  %v1694_v25 = vpop.f32.mrb[25].mxu0 }
 0x90e   : > { %v1337_v26 = vpop.f32.mrb[26].mxu0 }
 0x90f   : > { %v1343_v27 = vmul.f32 %v1335_v24, %v1335_v24  ;;  %v1338_v28 = vadd.f32 %v1573_v22, %v1337_v26  ;;  %v1695_v29 = vpop.f32.mrb[27].mxu0  ;;  %v1341_v41 = vmul.f32 0.5, %v1335_v24 }
 0x911   : > { %v1345_v30 = vmul.f32 %v1343_v27, %v1335_v24  ;;  %v1344_v31 = vmul.f32 %v1338_v28, %v1338_v28  ;;  %v1342_v43 = vmul.f32 0.5, %v1338_v28 }
 0x913   : > { %v1347_v32 = vmul.f32 0.044715, %v1345_v30  ;;  %v1346_v33 = vmul.f32 %v1344_v31, %v1338_v28 }
 0x915   : > { %v1349_v34 = vadd.f32 %v1347_v32, %v1335_v24  ;;  %v1348_v35 = vmul.f32 0.044715, %v1346_v33 }
 0x917   : > { %v1351_v36 = vmul.f32 0.7978846, %v1349_v34  ;;  %v1350_v15 = vadd.f32 %v1348_v35, %v1338_v28 }
 0x919   : > { %1810 = vtanh.f32 %v1351_v36  ;;  %v1352_v37 = vmul.f32 0.7978846, %v1350_v15 }
 0x91b   : > { %1812 = vtanh.f32 %v1352_v37 }
 0x923   : > { %v1811_v38 = vpop.eup %1810 }
 0x924   : > { %v1355_v39 = vadd.f32 1.0, %v1811_v38 }
 0x925   : > { %v1813_v40 = vpop.eup %1812 }
 0x926   : > { %v1356_v44 = vadd.f32 1.0, %v1813_v40  ;;  %v1357_v46 = vmul.f32 %v1355_v39, %v1341_v41 }
 0x928   : > { %v1358_v47 = vmul.f32 %v1356_v44, %v1342_v43 }
 0x92a   : > { %v1359_v48 = vpack.c.bf16 %v1358_v47, %v1357_v46 }
 0x92c   : > { %1713 = vmatmul.mubr.bf16.vlgmr.msra.gmra.mrb[16].mxu1 %v1359_v48 }
 0x9ff   : > { %v1458_v49 = vpop.f32.mrb[16].mxu1 }
 0xa00   : > { %v1465_v50 = vadd.f32 %v1458_v49, %v2079_v42  ;;  %v1714_v51 = vpop.f32.mrb[17].mxu1 }
 0xa01   : > { %v1461_v52 = vpop.f32.mrb[18].mxu1 }
 0xa02   : > { %v1474_v1 = vadd.f32 %v1585_v0, %v1465_v50  ;;  %v1466_v53 = vadd.f32 %v1461_v52, %v2082_v45  ;;  %v1715_v54 = vpop.f32.mrb[19].mxu1 }
 0xa04   : > { %1476 = vst.msk [vmem:[%s481_s17] sm:$0xff] %vm485_vm0, %v1474_v1  ;;  %v1475_v55 = vadd.f32 %v1585_v0, %v1466_v53 }
 0xa06   : > { %1477 = vst.msk [vmem:[%s481_s17 + $0x8] sm:$0xff] %vm485_vm0, %v1475_v55 }
 0xa07 PF: > { %s24_s29 = sadd.s32 1, %s1820_s29  }
 0xa08   : > { %p21_p4 = scmp.ge.s32.totalorder %s24_s29, 4  }
 0xa0a   :  { %23 = sbr.rel (!%p21_p4) target bundleno = 1 (0x1), region = 109 }

</bundles_post_ra>
